<compile_context>
chip_gen: v7x
topology: tpu7x:2x2x1
jax: 0.10.0
libtpu: 0.0.40
codegen_flags: <defaults>
</compile_context>

<pallas_src>
import functools
import math

import jax
import jax.numpy as jnp
from jax.experimental import pallas as pl
from jax.experimental.pallas import tpu as pltpu


_VMEM_LIMIT = 48 * 1024 * 1024      # fits v7x's 64 MiB physical VMEM with headroom
_TN = 512                           # lane-tile width for the conv GEMMs


# ----------------------------------------------------------------------------- utils
def _round_up(x, m):
    return (x + m - 1) // m * m


def relu(x):
    return jnp.maximum(x, 0.0)


# ----------------------------------------------------------------------------- Pallas GEMM (hot path for all convs)
def _mm_kernel(a_ref, b_ref, o_ref):
    # full-K single-shot matmul: bf16 operands, f32 accumulation, one store per tile
    o_ref[...] = jnp.dot(a_ref[...], b_ref[...],
                         preferred_element_type=jnp.float32)


def _gemm(w2d, cols):
    """w2d: (M, K) weights, cols: (K, N) im2col matrix -> (M, N) f32.

    M = output channels (<=128 here) is a single sublane block; N (batch*spatial) is
    tiled at _TN lanes; K is a single full block (no reduction grid axis)."""
    M, K = w2d.shape
    _, N = cols.shape
    a = w2d.astype(jnp.bfloat16)
    b = cols.astype(jnp.bfloat16)
    Mp = _round_up(M, 8)
    Kp = _round_up(K, 8)
    if Mp != M or Kp != K:                    # only the 3-channel first conv (K=27)
        a = jnp.pad(a, ((0, Mp - M), (0, Kp - K)))
    if Kp != K:
        b = jnp.pad(b, ((0, Kp - K), (0, 0)))
    tn = N if N <= _TN else _TN
    out = pl.pallas_call(
        _mm_kernel,
        out_shape=jax.ShapeDtypeStruct((Mp, N), jnp.float32),
        grid=(pl.cdiv(N, tn),),
        in_specs=[pl.BlockSpec((Mp, Kp), lambda j: (0, 0)),   # weights stay resident
                  pl.BlockSpec((Kp, tn), lambda j: (0, j))],
        out_specs=pl.BlockSpec((Mp, tn), lambda j: (0, j)),
        compiler_params=pltpu.CompilerParams(
            dimension_semantics=("parallel",),
            vmem_limit_bytes=_VMEM_LIMIT),
    )(a, b)
    return out[:M] if Mp != M else out


# ----------------------------------------------------------------------------- convolutions (im2col glue + Pallas GEMM)
@functools.partial(jax.jit, static_argnums=(2, 3, 4))
def conv2d(x, w, stride, pad, dilation):
    """x: (N, C, H, W), w: (O, C, kh, kw). PyTorch Conv2d semantics, bias=False."""
    O, C, kh, kw = w.shape
    N, _, H, W = x.shape
    xp = jnp.pad(x, ((0, 0), (0, 0), (pad, pad), (pad, pad)))
    Hp, Wp = H + 2 * pad, W + 2 * pad
    Ho = (Hp - (dilation * (kh - 1) + 1)) // stride + 1
    Wo = (Wp - (dilation * (kw - 1) + 1)) // stride + 1
    taps = []
    for i in range(kh):
        for j in range(kw):
            taps.append(xp[:, :,
                           i * dilation: i * dilation + (Ho - 1) * stride + 1: stride,
                           j * dilation: j * dilation + (Wo - 1) * stride + 1: stride])
    # (T, N, C, Ho, Wo) -> (C*T, N*Ho*Wo); row order (c, i, j) == PyTorch w.reshape(O,-1)
    cols = (jnp.stack(taps, axis=0)
            .transpose(2, 0, 1, 3, 4)
            .reshape(C * kh * kw, N * Ho * Wo)
            .astype(jnp.bfloat16))
    out = _gemm(w.reshape(O, -1), cols)                      # (O, N*Ho*Wo) f32
    return out.reshape(O, N, Ho, Wo).transpose(1, 0, 2, 3)   # leading-axis swap only


@functools.partial(jax.jit, static_argnums=(2, 3, 4))
def conv3d(x, w, stride, pad, dilation):
    """x: (N, C, D, H, W), w: (O, C, kd, kh, kw). PyTorch Conv3d semantics, bias=False."""
    O, C, kd, kh, kw = w.shape
    N, _, D, H, W = x.shape
    xp = jnp.pad(x, ((0, 0), (0, 0), (pad, pad), (pad, pad), (pad, pad)))
    Dp, Hp, Wp = D + 2 * pad, H + 2 * pad, W + 2 * pad
    Do = (Dp - (dilation * (kd - 1) + 1)) // stride + 1
    Ho = (Hp - (dilation * (kh - 1) + 1)) // stride + 1
    Wo = (Wp - (dilation * (kw - 1) + 1)) // stride + 1
    taps = []
    for a in range(kd):
        for b in range(kh):
            for c in range(kw):
                taps.append(xp[:, :,
                               a * dilation: a * dilation + (Do - 1) * stride + 1: stride,
                               b * dilation: b * dilation + (Ho - 1) * stride + 1: stride,
                               c * dilation: c * dilation + (Wo - 1) * stride + 1: stride])
    cols = (jnp.stack(taps, axis=0)
            .transpose(2, 0, 1, 3, 4, 5)
            .reshape(C * kd * kh * kw, N * Do * Ho * Wo)
            .astype(jnp.bfloat16))
    out = _gemm(w.reshape(O, -1), cols)                          # (O, N*Do*Ho*Wo)
    return out.reshape(O, N, Do, Ho, Wo).transpose(1, 0, 2, 3, 4)


@functools.partial(jax.jit, static_argnums=(2, 3, 4))
def conv_transpose3d(x, w, stride, pad, output_padding):
    """PyTorch ConvTranspose3d, bias=False. w: (Cin, Cout, k, k, k)."""
    N, I, D, H, W = x.shape
    _, O, k, _, _ = w.shape
    xd = jnp.zeros((N, I, (D - 1) * stride + 1, (H - 1) * stride + 1,
                    (W - 1) * stride + 1), x.dtype)
    xd = xd.at[:, :, ::stride, ::stride, ::stride].set(x)
    lo = k - 1 - pad
    hi = k - 1 - pad + output_padding
    xdp = jnp.pad(xd, ((0, 0), (0, 0), (lo, hi), (lo, hi), (lo, hi)))
    w_eff = jnp.flip(w, axis=(2, 3, 4)).transpose(1, 0, 2, 3, 4)   # (O, I, k, k, k)
    return conv3d(xdp, w_eff, 1, 0, 1)


# ----------------------------------------------------------------------------- norm layers (plain-JAX glue, train-mode stats)
def batchnorm2d(x, g, b, eps=1e-5):
    mean = jnp.mean(x, axis=(0, 2, 3), keepdims=True)
    var = jnp.mean((x - mean) ** 2, axis=(0, 2, 3), keepdims=True)
    xn = (x - mean) / jnp.sqrt(var + eps)
    return xn * g.reshape(1, -1, 1, 1) + b.reshape(1, -1, 1, 1)


def batchnorm3d(x, g, b, eps=1e-5):
    mean = jnp.mean(x, axis=(0, 2, 3, 4), keepdims=True)
    var = jnp.mean((x - mean) ** 2, axis=(0, 2, 3, 4), keepdims=True)
    xn = (x - mean) / jnp.sqrt(var + eps)
    return xn * g.reshape(1, -1, 1, 1, 1) + b.reshape(1, -1, 1, 1, 1)


def groupnorm3d(x, g, b, num_groups=2, eps=1e-5):
    N, C, D, H, W = x.shape
    xg = x.reshape(N, num_groups, C // num_groups, D, H, W)
    mean = jnp.mean(xg, axis=(2, 3, 4, 5), keepdims=True)
    var = jnp.mean((xg - mean) ** 2, axis=(2, 3, 4, 5), keepdims=True)
    xn = ((xg - mean) / jnp.sqrt(var + eps)).reshape(N, C, D, H, W)
    return xn * g.reshape(1, -1, 1, 1, 1) + b.reshape(1, -1, 1, 1, 1)


# ----------------------------------------------------------------------------- group-wise correlation volume
# L and R stay resident in VMEM (constant index_map over the disparity axis); the
# per-disparity shift of R is a static roll-by-one + zero-column recurrence kept in a
# VMEM scratch, so the maxdisp-stacked shifted-R tensor is never written to HBM.
@functools.partial(jax.jit, static_argnums=(2, 3))
def build_gwc_volume(L, R, maxdisp, num_groups):
    B, C, H, W = L.shape
    G = num_groups
    cpg = C // G

    # pick rows-per-block so that L, R (double-buffered) + the shifted-R scratch fit VMEM
    row_bytes = B * C * W * 4
    budget = 20 * 1024 * 1024
    max_th = max(1, budget // (5 * row_bytes))
    if max_th >= H or H <= 8:
        th = H
    else:
        th = max(8, (max_th // 8) * 8)
    nh = pl.cdiv(H, th)

    def kernel(l_ref, r_ref, o_ref, rs_ref):
        d = pl.program_id(1)

        @pl.when(d == 0)
        def _():                                  # new H tile: reset shifted R
            rs_ref[...] = r_ref[...]

        @pl.when(d > 0)
        def _():                                  # shift right by one pixel, zero col 0
            rolled = pltpu.roll(rs_ref[...], shift=1, axis=3)
            w_idx = jax.lax.broadcasted_iota(jnp.int32, rolled.shape, 3)
            rs_ref[...] = jnp.where(w_idx == 0, 0.0, rolled)

        prod = l_ref[...] * rs_ref[...]                                  # (B, C, th, W)
        cost = jnp.mean(prod.reshape(B, G, cpg, th, W), axis=2)          # (B, G, th, W)
        o_ref[...] = cost[:, :, None, :, :]

    return pl.pallas_call(
        kernel,
        out_shape=jax.ShapeDtypeStruct((B, G, maxdisp, H, W), L.dtype),
        grid=(nh, maxdisp),
        in_specs=[pl.BlockSpec((B, C, th, W), lambda h, d: (0, 0, h, 0)),
                  pl.BlockSpec((B, C, th, W), lambda h, d: (0, 0, h, 0))],
        out_specs=pl.BlockSpec((B, G, 1, th, W), lambda h, d: (0, 0, d, h, 0)),
        scratch_shapes=[pltpu.VMEM((B, C, th, W), L.dtype)],
        compiler_params=pltpu.CompilerParams(
            dimension_semantics=("parallel", "arbitrary"),
            vmem_limit_bytes=_VMEM_LIMIT),
    )(L, R)


# ----------------------------------------------------------------------------- warp (grid_sample along D -> batched Pallas GEMM)
def _bmm_kernel(m_ref, x_ref, o_ref):
    o_ref[0] = jnp.dot(m_ref[0], x_ref[0], preferred_element_type=jnp.float32)


@functools.partial(jax.jit, static_argnums=(2, 3))
def warp(x, calib, down, maxdepth):
    """x: (B, C, D, H, W). Bilinear resample along D at d = calib/(4*down*(j+1)),
    zero padding, align_corners=True — equivalent to the torch grid_sample in `warp`."""
    B, C, D, H, W = x.shape
    new_D = maxdepth // down
    depth = jnp.arange(1, 1 + new_D, dtype=jnp.float32)
    xx = (calib.astype(jnp.float32) / (down * 4.0))[:, None] / depth[None, :]  # (B, new_D)
    gx = 2.0 * xx / max(D - 1, 1) - 1.0            # normalize (as in torch code)
    p = (gx + 1.0) * 0.5 * (D - 1)                 # unnormalize (align_corners=True)
    d0 = jnp.floor(p)
    frac = p - d0
    d0i = d0.astype(jnp.int32)
    d1i = d0i + 1
    w0 = jnp.where((d0i >= 0) & (d0i <= D - 1), 1.0 - frac, 0.0)
    w1 = jnp.where((d1i >= 0) & (d1i <= D - 1), frac, 0.0)
    Mw = (jax.nn.one_hot(jnp.clip(d0i, 0, D - 1), D, dtype=jnp.float32) * w0[..., None] +
          jax.nn.one_hot(jnp.clip(d1i, 0, D - 1), D, dtype=jnp.float32) * w1[..., None])  # (B, new_D, D)

    CHW = C * H * W
    xr = x.transpose(0, 2, 1, 3, 4).reshape(B, D, CHW).astype(jnp.float32)
    tn = CHW if CHW <= _TN else _TN
    out = pl.pallas_call(
        _bmm_kernel,
        out_shape=jax.ShapeDtypeStruct((B, new_D, CHW), jnp.float32),
        grid=(B, pl.cdiv(CHW, tn)),
        in_specs=[pl.BlockSpec((1, new_D, D), lambda b, j: (b, 0, 0)),
                  pl.BlockSpec((1, D, tn), lambda b, j: (b, 0, j))],
        out_specs=pl.BlockSpec((1, new_D, tn), lambda b, j: (b, 0, j)),
        compiler_params=pltpu.CompilerParams(
            dimension_semantics=("parallel", "parallel"),
            vmem_limit_bytes=_VMEM_LIMIT),
    )(Mw, xr)
    return out.reshape(B, new_D, C, H, W).transpose(0, 2, 1, 3, 4).astype(x.dtype)


# ----------------------------------------------------------------------------- deterministic parameter init (synthetic, matches module shapes)
class KeyGen:
    def __init__(self, seed):
        self._key = jax.random.PRNGKey(seed)

    def __call__(self):
        self._key, sub = jax.random.split(self._key)
        return sub


def conv2d_weight(kg, i, o, k):
    std = math.sqrt(2.0 / (k * k * o))
    return std * jax.random.normal(kg(), (o, i, k, k), jnp.float32)


def conv3d_weight(kg, i, o, k):
    std = math.sqrt(2.0 / (k * k * k * o))
    return std * jax.random.normal(kg(), (o, i, k, k, k), jnp.float32)


def convbn2d_params(kg, i, o, k):
    return {'w': conv2d_weight(kg, i, o, k),
            'g': jnp.ones((o,), jnp.float32), 'b': jnp.zeros((o,), jnp.float32)}


def convbn3d_params(kg, i, o, k):
    return {'w': conv3d_weight(kg, i, o, k),
            'g': jnp.ones((o,), jnp.float32), 'b': jnp.zeros((o,), jnp.float32)}


def deconv3d_params(kg, i, o, k):
    std = math.sqrt(2.0 / (k * k * k * o))
    return {'w': std * jax.random.normal(kg(), (i, o, k, k, k), jnp.float32),
            'g': jnp.ones((o,), jnp.float32), 'b': jnp.zeros((o,), jnp.float32)}


def init_feature_extraction(kg):
    p = {}
    p['firstconv'] = [dict(**convbn2d_params(kg, 3, 32, 3), stride=2),
                      dict(**convbn2d_params(kg, 32, 32, 3), stride=1),
                      dict(**convbn2d_params(kg, 32, 32, 3), stride=1)]
    inplanes = [32]

    def make_layer(planes, blocks, stride, dilation):
        layers = []
        for bi in range(blocks):
            s = stride if bi == 0 else 1
            blk = {'conv1': convbn2d_params(kg, inplanes[0], planes, 3),
                   'conv2': convbn2d_params(kg, planes, planes, 3),
                   'stride': s, 'dilation': dilation, 'down': None}
            if bi == 0 and (stride != 1 or inplanes[0] != planes):
                blk['down'] = convbn2d_params(kg, inplanes[0], planes, 1)
            layers.append(blk)
            inplanes[0] = planes
        return layers

    p['layer1'] = make_layer(32, 3, 1, 1)
    p['layer2'] = make_layer(64, 16, 2, 1)
    p['layer3'] = make_layer(128, 3, 1, 1)
    p['layer4'] = make_layer(128, 3, 1, 2)
    return p


def init_gwc_encoder(maxdisp, num_groups=40, seed=0):
    kg = KeyGen(seed)
    p = {'fe': init_feature_extraction(kg)}
    p['dres0'] = [convbn3d_params(kg, num_groups, 32, 3), convbn3d_params(kg, 32, 32, 3)]
    p['dres1'] = [convbn3d_params(kg, 32, 32, 3), convbn3d_params(kg, 32, 32, 3)]

    def hourglass_params(c):
        return {'conv1': convbn3d_params(kg, c, 2 * c, 3),
                'conv2': convbn3d_params(kg, 2 * c, 2 * c, 3),
                'conv3': convbn3d_params(kg, 2 * c, 4 * c, 3),
                'conv4': convbn3d_params(kg, 4 * c, 4 * c, 3),
                'conv5': deconv3d_params(kg, 4 * c, 2 * c, 3),
                'conv6': deconv3d_params(kg, 2 * c, c, 3),
                'redir1': convbn3d_params(kg, c, c, 1),
                'redir2': convbn3d_params(kg, 2 * c, 2 * c, 1)}

    p['dres2'] = hourglass_params(32)
    p['dres3'] = hourglass_params(32)
    p['dres4'] = hourglass_params(32)
    p['classif3'] = [convbn3d_params(kg, 32, 32, 3), {'w': conv3d_weight(kg, 32, 1, 3)}]
    return p


# ----------------------------------------------------------------------------- forward passes
def basic_block_fwd(blk, x):
    dil = blk['dilation']
    pad = dil if dil > 1 else 1
    out = relu(batchnorm2d(conv2d(x, blk['conv1']['w'], blk['stride'], pad, dil),
                           blk['conv1']['g'], blk['conv1']['b']))
    out = batchnorm2d(conv2d(out, blk['conv2']['w'], 1, pad, dil),
                      blk['conv2']['g'], blk['conv2']['b'])
    if blk['down'] is not None:
        x = batchnorm2d(conv2d(x, blk['down']['w'], blk['stride'], 0, 1),
                        blk['down']['g'], blk['down']['b'])
    return out + x


def feature_extraction_fwd(p, x):
    for cp in p['firstconv']:
        x = relu(batchnorm2d(conv2d(x, cp['w'], cp['stride'], 1, 1), cp['g'], cp['b']))
    for blk in p['layer1']:
        x = basic_block_fwd(blk, x)
    l2 = x
    for blk in p['layer2']:
        l2 = basic_block_fwd(blk, l2)
    l3 = l2
    for blk in p['layer3']:
        l3 = basic_block_fwd(blk, l3)
    l4 = l3
    for blk in p['layer4']:
        l4 = basic_block_fwd(blk, l4)
    return jnp.concatenate([l2, l3, l4], axis=1)            # 64 + 128 + 128 = 320 channels


def hourglass_fwd(p, x):
    c1 = relu(groupnorm3d(conv3d(x, p['conv1']['w'], 2, 1, 1), p['conv1']['g'], p['conv1']['b']))
    c2 = relu(groupnorm3d(conv3d(c1, p['conv2']['w'], 1, 1, 1), p['conv2']['g'], p['conv2']['b']))
    c3 = relu(groupnorm3d(conv3d(c2, p['conv3']['w'], 2, 1, 1), p['conv3']['g'], p['conv3']['b']))
    c4 = relu(groupnorm3d(conv3d(c3, p['conv4']['w'], 1, 1, 1), p['conv4']['g'], p['conv4']['b']))
    c5 = batchnorm3d(conv_transpose3d(c4, p['conv5']['w'], 2, 1, 1), p['conv5']['g'], p['conv5']['b'])
    r2 = groupnorm3d(conv3d(c2, p['redir2']['w'], 1, 0, 1), p['redir2']['g'], p['redir2']['b'])
    c5 = relu(c5 + r2)
    c6 = batchnorm3d(conv_transpose3d(c5, p['conv6']['w'], 2, 1, 1), p['conv6']['g'], p['conv6']['b'])
    r1 = groupnorm3d(conv3d(x, p['redir1']['w'], 1, 0, 1), p['redir1']['g'], p['redir1']['b'])
    return relu(c6 + r1)


def gwc_encoder_fwd(p, left, right, calib, maxdisp, num_groups=40):
    feat_l = feature_extraction_fwd(p['fe'], left)
    feat_r = feature_extraction_fwd(p['fe'], right)
    volume = build_gwc_volume(feat_l, feat_r, maxdisp, num_groups)
    volume = warp(volume, calib, 1, int(volume.shape[2]))

    x = volume
    for cp in p['dres0']:
        x = relu(groupnorm3d(conv3d(x, cp['w'], 1, 1, 1), cp['g'], cp['b']))
    cost0 = x
    y = relu(groupnorm3d(conv3d(cost0, p['dres1'][0]['w'], 1, 1, 1),
                         p['dres1'][0]['g'], p['dres1'][0]['b']))
    y = groupnorm3d(conv3d(y, p['dres1'][1]['w'], 1, 1, 1),
                    p['dres1'][1]['g'], p['dres1'][1]['b'])
    cost0 = y + cost0

    out1 = hourglass_fwd(p['dres2'], cost0)
    out2 = hourglass_fwd(p['dres3'], out1)
    out3 = hourglass_fwd(p['dres4'], out2)

    c = relu(groupnorm3d(conv3d(out3, p['classif3'][0]['w'], 1, 1, 1),
                         p['classif3'][0]['g'], p['classif3'][0]['b']))
    cost3 = conv3d(c, p['classif3'][1]['w'], 1, 1, 1)
    return {'classfy_volume': cost3}


# ----------------------------------------------------------------------------- main
if __name__ == "__main__":
    B, H_img, W_img = 2, 32, 32
    maxdisp = 8          # small, divisible by 4 (two stride-2 levels in the hourglass)

    key = jax.random.PRNGKey(0)
    k_left, k_right = jax.random.split(key)
    left = jax.random.normal(k_left, (B, 3, H_img, W_img), jnp.float32)
    right = jax.random.normal(k_right, (B, 3, H_img, W_img), jnp.float32)
    calib = jnp.array([20.0, 14.0], jnp.float32)

    params = init_gwc_encoder(maxdisp, num_groups=40, seed=0)
    out = gwc_encoder_fwd(params, left, right, calib, maxdisp, num_groups=40)
    vol = out['classfy_volume']
    jax.block_until_ready(vol)

    assert vol.shape == (B, 1, maxdisp, H_img // 4, W_img // 4), vol.shape
    assert bool(jnp.all(jnp.isfinite(vol)))
    print("KERNEL_OK")
</pallas_src>

<mosaic_0001>
module attributes {stable_mosaic.version = 11 : i64} {
  func.func @_mm_kernel(%arg0: i32, %arg1: memref<32x32xbf16, #tpu.memory_space<vmem>>, %arg2: memref<32x512xbf16, #tpu.memory_space<vmem>>, %arg3: memref<32x512xf32, #tpu.memory_space<vmem>>) attributes {dimension_semantics = [#tpu.dimension_semantics<parallel>], iteration_bounds = array<i64: 1>, scalar_prefetch = 0 : i64, scratch_operands = 0 : i64, tpu.core_type = #tpu.core_type<tc>, window_params = [{pipeline_mode = #tpu.pipeline_mode<synchronous>, transform_indices = @transform_0, window_bounds = array<i64: 32, 32>}, {transform_indices = @transform_1, window_bounds = array<i64: 32, 512>}, {transform_indices = @transform_2, window_bounds = array<i64: 32, 512>}]} {
    %c0 = arith.constant 0 : index
    %c0_0 = arith.constant 0 : index
    %0 = vector.load %arg1[%c0, %c0_0] : memref<32x32xbf16, #tpu.memory_space<vmem>>, vector<32x32xbf16>
    %c0_1 = arith.constant 0 : index
    %c0_2 = arith.constant 0 : index
    %1 = vector.load %arg2[%c0_1, %c0_2] : memref<32x512xbf16, #tpu.memory_space<vmem>>, vector<32x512xbf16>
    %cst = arith.constant dense<0.000000e+00> : vector<32x512xf32>
    %2 = tpu.matmul %0, %1, %cst {dimension_numbers = #tpu.dot_dimension_numbers<[1], [0], [0], [1], [0, 0, 1, 1], [], []>} : vector<32x32xbf16>, vector<32x512xbf16>, vector<32x512xf32> -> vector<32x512xf32>
    %c0_3 = arith.constant 0 : index
    %c0_4 = arith.constant 0 : index
    %3 = vector.load %arg3[%c0_3, %c0_4] : memref<32x512xf32, #tpu.memory_space<vmem>>, vector<32x512xf32>
    tpu.vector_store %arg3[%c0_3, %c0_4], %2 {strides = array<i32>} : memref<32x512xf32, #tpu.memory_space<vmem>>, vector<32x512xf32>,
    return
  }
  func.func @transform_0(%arg0: i32) -> (i32, i32) {
    %c0_i32 = arith.constant 0 : i32
    %c0_i32_0 = arith.constant 0 : i32
    %c0_i32_1 = arith.constant 0 : i32
    return %c0_i32, %c0_i32_0 : i32, i32
  }
  func.func @transform_1(%arg0: i32) -> (i32, i32) {
    %c0_i32 = arith.constant 0 : i32
    %c0_i32_0 = arith.constant 0 : i32
    return %c0_i32, %arg0 : i32, i32
  }
  func.func @transform_2(%arg0: i32) -> (i32, i32) {
    %c0_i32 = arith.constant 0 : i32
    %c0_i32_0 = arith.constant 0 : i32
    return %c0_i32, %arg0 : i32, i32
  }
}

</mosaic_0001>

<bundles_post_ra>
// kernel: conv2d.1
= control target key start
LH: loop header
LB: loop body
LE: loop exit
PB: predicated region body
PF: predicated region fallthrough
CT: control target
= control target key end

     0   :  { %v236_v1 = vmov 0   ;;  %vm74_vm0 = vcmask 261120   ;;  %s330_s1 = inlined_call_operand.vmem [shape: bf16[32,512], index: 1, kind: input, shape index: {}]   ;;  %s331_s0 = inlined_call_operand.vmem [shape: bf16[32,32], index: 0, kind: input, shape index: {}]   ;;  %s332_s2 = inlined_call_operand.vmem [shape: f32[32,512], index: 2, kind: output, shape index: {}]  }
   0x1   :  { %v222_v0 = vld [vmem:[%s330_s1 + $0x4] ss:$16 sps:$4 sm:$0xff]   ;;  %113 = vmatprep.mubr.bf16.mxu0 %v236_v1  ;;  %166 = vmatprep.mubr.bf16.mxu1 %v236_v1  ;;  %v224_v2 = vld [vmem:[%s330_s1 + $0xc] ss:$16 sps:$4 sm:$0xff]   ;;  %v226_v3 = vld [vmem:[%s330_s1] ss:$16 sps:$4 sm:$0xff]  }
   0x2   :  { %81 = vmatprep.subr.bf16.mxu0 %v222_v0  ;;  %v227_v4 = vld [vmem:[%s330_s1 + $0x8] ss:$16 sps:$4 sm:$0xff]   ;;  %134 = vmatprep.subr.bf16.mxu1 %v224_v2  ;;  %v228_v5 = vld [vmem:[%s330_s1 + $0x24] ss:$16 sps:$4 sm:$0xff]   ;;  %v230_v6 = vld [vmem:[%s330_s1 + $0x2c] ss:$16 sps:$4 sm:$0xff]  }
   0x3   :  { %82 = vmatpush1.bf16.msra.mxu0 %v226_v3  ;;  %135 = vmatpush1.bf16.msra.mxu1 %v227_v4  ;;  %v232_v7 = vld [vmem:[%s330_s1 + $0x20] ss:$16 sps:$4 sm:$0xff]   ;;  %v233_v8 = vld [vmem:[%s330_s1 + $0x28] ss:$16 sps:$4 sm:$0xff]  }
   0x4   :  { %83 = vmatprep.subr.bf16.mxu0 %v228_v5  ;;  %136 = vmatprep.subr.bf16.mxu1 %v230_v6  ;;  %v234_v9 = vld [vmem:[%s331_s0] sm:$0xff]   ;;  %v235_v10 = vld [vmem:[%s331_s0 + $0x8] sm:$0xff]  }
   0x7   :  { %84 = vmatpush1.bf16.msra.mxu0 %v232_v7  ;;  %137 = vmatpush1.bf16.msra.mxu1 %v233_v8 }
   0xa   :  { %217 = vmatmul.mubr.msk.bf16.vlgmr.msra.gmra.mrb[0].mxu0 %vm74_vm0, %v234_v9  ;;  %219 = vmatmul.mubr.msk.bf16.vlgmr.msra.gmra.mrb[0].mxu1 %vm74_vm0, %v234_v9 }
   0xb   :  { %123 = vmatprep.mubr.bf16.mxu0 %v236_v1  ;;  %176 = vmatprep.mubr.bf16.mxu1 %v236_v1 }
  0x12   :  { %218 = vmatmul.mubr.msk.bf16.gmra.mrb[4].mxu0 %vm74_vm0, %v235_v10  ;;  %220 = vmatmul.mubr.msk.bf16.gmra.mrb[4].mxu1 %vm74_vm0, %v235_v10 }
  0xdd   :  { %v115_v11 = vpop.f32.mrb[0].mxu0  ;;  %v168_v12 = vpop.f32.mrb[0].mxu1 }
  0xde   :  { %187 = vst [vmem:[%s332_s2] sm:$0xff] %v115_v11  ;;  %189 = vst [vmem:[%s332_s2 + $0x10] sm:$0xff] %v168_v12  ;;  %v117_v13 = vpop.f32.mrb[1].mxu0  ;;  %v170_v14 = vpop.f32.mrb[1].mxu1 }
  0xdf   :  { %188 = vst [vmem:[%s332_s2 + $0x8] sm:$0xff] %v117_v13  ;;  %190 = vst [vmem:[%s332_s2 + $0x18] sm:$0xff] %v170_v14  ;;  %v119_v15 = vpop.f32.mrb[2].mxu0  ;;  %v172_v16 = vpop.f32.mrb[2].mxu1 }
  0xe0   :  { %191 = vst [vmem:[%s332_s2 + $0x20] sm:$0xff] %v119_v15  ;;  %193 = vst [vmem:[%s332_s2 + $0x30] sm:$0xff] %v172_v16  ;;  %v121_v17 = vpop.f32.mrb[3].mxu0  ;;  %v174_v18 = vpop.f32.mrb[3].mxu1 }
  0xe1   :  { %192 = vst [vmem:[%s332_s2 + $0x28] sm:$0xff] %v121_v17  ;;  %194 = vst [vmem:[%s332_s2 + $0x38] sm:$0xff] %v174_v18 }
  0xe5   :  { %v125_v19 = vpop.f32.mrb[4].mxu0  ;;  %v178_v20 = vpop.f32.mrb[4].mxu1 }
  0xe6   :  { %195 = vst [vmem:[%s332_s2 + $0x40] sm:$0xff] %v125_v19  ;;  %197 = vst [vmem:[%s332_s2 + $0x50] sm:$0xff] %v178_v20  ;;  %v127_v21 = vpop.f32.mrb[5].mxu0  ;;  %v180_v22 = vpop.f32.mrb[5].mxu1 }
  0xe7   :  { %196 = vst [vmem:[%s332_s2 + $0x48] sm:$0xff] %v127_v21  ;;  %198 = vst [vmem:[%s332_s2 + $0x58] sm:$0xff] %v180_v22  ;;  %v129_v23 = vpop.f32.mrb[6].mxu0  ;;  %v182_v24 = vpop.f32.mrb[6].mxu1 }
  0xe8   :  { %199 = vst [vmem:[%s332_s2 + $0x60] sm:$0xff] %v129_v23  ;;  %201 = vst [vmem:[%s332_s2 + $0x70] sm:$0xff] %v182_v24  ;;  %v131_v25 = vpop.f32.mrb[7].mxu0  ;;  %v184_v26 = vpop.f32.mrb[7].mxu1 }
  0xe9   :  { %200 = vst [vmem:[%s332_s2 + $0x68] sm:$0xff] %v131_v25  ;;  %202 = vst [vmem:[%s332_s2 + $0x78] sm:$0xff] %v184_v26 }

</bundles_post_ra>
